<compile_context>
chip_gen: v6e
topology: v6e:2x2x1
jax: 0.10.0
libtpu: 0.0.40
codegen_flags: <defaults>
</compile_context>

<pallas_src>
import jax
import jax.numpy as jnp
from jax.experimental import pallas as pl
from jax.experimental.pallas import tpu as pltpu

_SMALL_BYPASS_BYTES = 1 << 20  # below this, pallas dispatch overhead dominates


def _hbm_copy_kernel(t_ref, o_ref, sem):
    # One direct HBM->HBM DMA descriptor for the whole parameter.
    # No VMEM staging: a pure copy has zero compute, so a round trip through
    # VMEM buys nothing and only adds per-tile overhead.
    cp = pltpu.make_async_copy(t_ref, o_ref, sem)
    cp.start()
    cp.wait()


def _hbm_to_hbm_copy(t):
    nbytes = t.size * jnp.dtype(t.dtype).itemsize
    return pl.pallas_call(
        _hbm_copy_kernel,
        out_shape=jax.ShapeDtypeStruct(t.shape, t.dtype),
        in_specs=[pl.BlockSpec(memory_space=pl.ANY)],
        out_specs=pl.BlockSpec(memory_space=pl.ANY),
        scratch_shapes=[pltpu.SemaphoreType.DMA],
        cost_estimate=pl.CostEstimate(
            flops=0, transcendentals=0, bytes_accessed=2 * nbytes),
    )(t)


def tensor_module_forward(t, *args, materialize=True, force_kernel=False, **kwargs):
    """Pallas equivalent of TensorModule.forward: returns the parameter `t`.

    All *args/**kwargs are ignored (matching the PyTorch module).

      materialize=False : faithful zero-cost equivalent (returns `t` itself,
                          no HBM traffic).
      materialize=True  : returns a fresh buffer holding the same values.
                          Small params (< ~1 MiB) use a plain XLA copy since
                          kernel dispatch would dominate; larger params use a
                          single direct HBM->HBM DMA Pallas kernel.
      force_kernel=True : always take the Pallas DMA path (used for testing).
    """
    del args, kwargs
    if not materialize or t.size == 0:
        return t

    nbytes = t.size * jnp.dtype(t.dtype).itemsize
    if nbytes < _SMALL_BYPASS_BYTES and not force_kernel:
        return jnp.copy(t)

    orig_shape = t.shape
    src = t.reshape(1) if t.ndim == 0 else t  # give the DMA a >=1-D ref
    out = _hbm_to_hbm_copy(src)
    return out.reshape(orig_shape)


class TensorModuleJAX:
    """Wraps a single tensor and returns it on forward(), like the PyTorch module."""

    def __init__(self, t):
        self.t = t  # the "parameter"

    def __call__(self, *args, **kwargs):
        return tensor_module_forward(self.t, *args, **kwargs)


if __name__ == "__main__":
    key = jax.random.PRNGKey(0)
    k_param, k_input = jax.random.split(key)

    # Deterministic parameter init (small, tile-aligned: 16 x 256, f32).
    t = jax.random.normal(k_param, (16, 256), dtype=jnp.float32)

    module = TensorModuleJAX(t)

    # Dummy call args (ignored by forward, same as the PyTorch module).
    x = jax.random.normal(k_input, (2, 4, 16, 16), dtype=jnp.float32)

    # Exercise the Pallas direct HBM->HBM DMA kernel.
    out = module(x, some_kwarg=123, force_kernel=True)
    out = jax.block_until_ready(out)
    assert out.shape == t.shape and out.dtype == t.dtype
    assert bool(jnp.allclose(out, t))

    # Small-param bypass (plain XLA copy, no kernel dispatch).
    out_bypass = module(x)
    out_bypass = jax.block_until_ready(out_bypass)
    assert bool(jnp.allclose(out_bypass, t))

    # Zero-cost path (the faithful no-op equivalent of the PyTorch forward).
    out_fast = tensor_module_forward(t, x, materialize=False)
    assert out_fast is t

    print("KERNEL_OK")
</pallas_src>

<mosaic_0001>
module attributes {stable_mosaic.version = 11 : i64} {
  func.func @_hbm_copy_kernel(%arg0: memref<16x256xf32, #tpu.memory_space<any>>, %arg1: memref<16x256xf32, #tpu.memory_space<any>>, %arg2: memref<!tpu.dma_semaphore, #tpu.memory_space<semaphore_mem>>) attributes {dimension_semantics = [], scalar_prefetch = 0 : i64, scratch_operands = 1 : i64, tpu.core_type = #tpu.core_type<tc>} {
    tpu.enqueue_dma source(%arg0 : memref<16x256xf32, #tpu.memory_space<any>>) target(%arg1 : memref<16x256xf32, #tpu.memory_space<any>>) target_semaphore(%arg2 : memref<!tpu.dma_semaphore, #tpu.memory_space<semaphore_mem>>)
    tpu.wait_dma2 semaphore(%arg2 : memref<!tpu.dma_semaphore, #tpu.memory_space<semaphore_mem>>) src(%arg0 : memref<16x256xf32, #tpu.memory_space<any>>) dst(%arg1 : memref<16x256xf32, #tpu.memory_space<any>>)
    return
  }
}

</mosaic_0001>

<bundles_post_ra>
// kernel: tpu_custom_call.1
= control target key start
LH: loop header
LB: loop body
LE: loop exit
PB: predicated region body
PF: predicated region fallthrough
CT: control target
= control target key end

     0   :  { %s29_s6 = smov [#allocation2]   ;;  %s30_s7 = smov 131072   ;;  %s48_s0 = inlined_call_operand.hbm [shape: f32[16,256], index: 0, kind: input, shape index: {}]   ;;  %s49_s1 = inlined_call_operand.hbm [shape: f32[16,256], index: 1, kind: output, shape index: {}]  }
   0x1   :  { %s31_s8 = smov 0  }
   0x2   :  { %12 = dma.general %s48_s0, 512, %s49_s1, %s29_s6, %s30_s7, [#allocation4], %s31_s8, 0  }
   0x3   :  { %27 = dma.done.wait [#allocation2], 512 }
   0x4   :  { %28 = vsyncadd [#allocation2], 4294966784 }
   0x5   :  { %17 = vsyncmov [#allocation2] }
   0x8   :  { %s18_s13 = vpop.sfrf %17 }
   0x9   :  { %p23_p0 = scmp.ne.s32.totalorder %s18_s13, 0 }
   0xb   :  { %22 = shalt.err (%p23_p0)  }

</bundles_post_ra>
